<compile_context>
chip_gen: v7x
topology: tpu7x:2x2x1
jax: 0.10.0
libtpu: 0.0.40
codegen_flags: <defaults>
</compile_context>

<pallas_src>
import jax
import jax.numpy as jnp
from jax.experimental import pallas as pl
from jax.experimental.pallas import tpu as pltpu


def _round_up(x, m):
    return ((x + m - 1) // m) * m


# ----------------------------- Pallas kernel --------------------------------
def _make_vmlp_kernel(n_hidden):
    """Builds the kernel for a given number of hidden layers.

    Ref layout (inputs then output):
      x_ref : (tile_p, pack*obs_dim) f32   -- `pack` obs rows per VMEM row
      wi_bd : (pack*d_in, pack*d_out) bf16 -- block-diagonal hidden weights
      bi_t  : (1, pack*d_out) f32          -- tiled biases
      s_w3  : (pack*d_last, pack) f32      -- block-diag value head (group sum)
      b3    : (1, 1) f32
      out   : (tile_p, pack) f32           -- v in packed layout
    """
    def kernel(x_ref, *refs):
        o_ref = refs[-1]
        b3_ref = refs[-2]
        s_ref = refs[-3]
        h = x_ref[...]                           # f32 tile straight from HBM
        for layer in range(n_hidden):
            w = refs[2 * layer][...]             # bf16, VMEM-resident
            b = refs[2 * layer + 1][...]
            # In-kernel f32->bf16 cast on the VPU (covers the x cast on layer
            # 0), then a bf16 MXU matmul with f32 accumulation.
            h = jnp.dot(h.astype(jnp.bfloat16), w,
                        preferred_element_type=jnp.float32)
            h = jnp.maximum(h + b, 0.0)
        # Value head: per-packed-row group sums via a tiny f32 matmul; keeps
        # the degenerate (H_last -> 1) projection cheap and the result packed.
        v = jnp.dot(h, s_ref[...], preferred_element_type=jnp.float32)
        # TODO(synk): emit v transposed to (pack, tile_p) for fully lane-dense
        # stores; the (tile_p, pack) store uses masked vst on `pack` lanes.
        o_ref[...] = (v + b3_ref[0, 0]).astype(o_ref.dtype)

    return kernel


def _const_spec(shape):
    # Full-array block, constant index_map -> stays resident in VMEM.
    nd = len(shape)
    return pl.BlockSpec(shape, lambda i: (0,) * nd)


def _mlp_pallas(x2d, params, pack, tile_rows_default=8192):
    """x2d: (N, obs_dim) f32 -> (N,) f32 via the Pallas kernel."""
    n, obs_dim = x2d.shape
    n_hidden = (len(params) - 2) // 2

    gran = 8 * pack                          # packed-row sublane granularity
    n_pk = _round_up(max(n, 1), gran)
    if n_pk != n:
        # Tiny alignment pad (< 8*pack rows); unlike padding to a full tile
        # multiple this is skipped whenever N is already 8*pack aligned.
        x2d = jnp.pad(x2d, ((0, n_pk - n), (0, 0)))
    # Free, contiguous reshape: `pack` obs rows per 128-lane VMEM row.
    xp = x2d.reshape(n_pk // pack, pack * obs_dim)

    # Large row tile (amortizes per-step overhead), capped so the row grid
    # keeps >= 2 steps when possible (v7x has 2 TCs) and never exceeds the data.
    half = _round_up(-(-n_pk // 2), gran)
    tile_rows = min(_round_up(tile_rows_default, gran), half)
    tile_p = tile_rows // pack               # packed rows per block (mult. of 8)
    grid_n = pl.cdiv(n_pk // pack, tile_p)

    # Advisory cost hint for XLA's scheduler around this mem-bound kernel.
    sizes = [obs_dim] + [int(params[2 * l].shape[1]) // pack
                         for l in range(n_hidden)]
    flops = 2 * n_pk * (sum(a * b for a, b in zip(sizes[:-1], sizes[1:]))
                        + sizes[-1])
    bytes_accessed = (n_pk * obs_dim * 4 + n_pk * 4
                      + sum(int(p.size) * p.dtype.itemsize for p in params))

    out = pl.pallas_call(
        _make_vmlp_kernel(n_hidden),
        out_shape=jax.ShapeDtypeStruct((grid_n * tile_p, pack), jnp.float32),
        grid=(grid_n,),
        in_specs=[pl.BlockSpec((tile_p, pack * obs_dim), lambda i: (i, 0))]
                + [_const_spec(p.shape) for p in params],
        out_specs=pl.BlockSpec((tile_p, pack), lambda i: (i, 0)),
        compiler_params=pltpu.CompilerParams(
            dimension_semantics=("parallel",)),   # shards rows across TCs (v7x)
        cost_estimate=pl.CostEstimate(flops=int(flops), transcendentals=0,
                                      bytes_accessed=int(bytes_accessed)),
    )(xp, *params)

    return out.reshape(-1)[:n]


# ----------------------------- Module wrapper --------------------------------
def infer_leading_dims(x, dim):
    """Mirror of rlpyt.utils.tensor.infer_leading_dims for ndarrays."""
    lead_dim = x.ndim - dim
    assert lead_dim in (0, 1, 2)
    if lead_dim == 2:
        T, B = x.shape[:2]
    elif lead_dim == 1:
        T, B = 1, x.shape[0]
    else:
        T, B = 1, 1
    shape = x.shape[lead_dim:]
    return lead_dim, T, B, shape


def restore_leading_dims(v, lead_dim, T, B):
    if lead_dim == 2:
        return v.reshape((T, B) + v.shape[1:])
    if lead_dim == 1:
        return v.reshape((B,) + v.shape[1:])
    return v.reshape(v.shape[1:]) if v.shape[0] == 1 else v[0]


class VMlpModelPallas:
    """Pallas-TPU port of rlpyt's VMlpModel forward pass."""

    def __init__(self, observation_shape, hidden_sizes, key):
        self._obs_ndim = len(observation_shape)
        in_dim = 1
        for d in observation_shape:
            in_dim *= int(d)
        sizes = [in_dim] + list(hidden_sizes) + [1]

        keys = jax.random.split(key, 2 * (len(sizes) - 1))
        raw = []
        for i in range(len(sizes) - 1):
            fan_in, fan_out = sizes[i], sizes[i + 1]
            bound = 1.0 / float(fan_in) ** 0.5     # torch Linear-style init
            w = jax.random.uniform(keys[2 * i], (fan_in, fan_out),
                                   minval=-bound, maxval=bound,
                                   dtype=jnp.float32)
            b = jax.random.uniform(keys[2 * i + 1], (1, fan_out),
                                   minval=-bound, maxval=bound,
                                   dtype=jnp.float32)
            raw += [w, b]
        self._raw = tuple(raw)                     # f32 reference weights

        # Lane-packing factor: obs rows sharing one 128-lane VMEM row.
        pack = 128 // in_dim if (in_dim <= 128 and 128 % in_dim == 0) else 1
        self.pack = pack

        eye = jnp.eye(pack, dtype=jnp.float32)
        packed = []
        for i in range(len(hidden_sizes)):
            w, b = raw[2 * i], raw[2 * i + 1]
            packed.append(jnp.kron(eye, w).astype(jnp.bfloat16))  # block-diag
            packed.append(jnp.tile(b, (1, pack)))                 # tiled bias
        w_out, b_out = raw[-2], raw[-1]            # (H_last, 1), (1, 1)
        packed.append(jnp.kron(eye, w_out))        # (pack*H_last, pack), f32
        packed.append(b_out.reshape(1, 1))
        self.params = tuple(packed)

    def __call__(self, observation, prev_action=None, prev_reward=None):
        lead_dim, T, B, _ = infer_leading_dims(observation, self._obs_ndim)
        x2d = observation.reshape(T * B, -1)
        v = _mlp_pallas(x2d, self.params, self.pack)      # (T*B,)
        return restore_leading_dims(v, lead_dim, T, B)


# ------------------------------- Reference -----------------------------------
def _reference_forward(model, observation):
    """Pure-JAX reference using the unpacked f32 weights, same dtype path."""
    lead_dim, T, B, _ = infer_leading_dims(observation, model._obs_ndim)
    h = observation.reshape(T * B, -1)
    raw = model._raw
    n_hidden = len(raw) // 2 - 1
    for i in range(n_hidden):
        w, b = raw[2 * i], raw[2 * i + 1]
        h = jnp.dot(h.astype(jnp.bfloat16), w.astype(jnp.bfloat16),
                    preferred_element_type=jnp.float32)
        h = jnp.maximum(h + b, 0.0)
    w_out, b_out = raw[-2], raw[-1]
    v = jnp.dot(h, w_out)[:, 0] + b_out[0, 0]
    return restore_leading_dims(v, lead_dim, T, B)


# --------------------------------- Main ---------------------------------------
if __name__ == "__main__":
    key = jax.random.PRNGKey(0)
    k_obs, k_params = jax.random.split(key)

    observation_shape = (16,)          # obs_ndim = 1 -> pack = 8
    hidden_sizes = [32, 32]
    B = 2

    model = VMlpModelPallas(observation_shape, hidden_sizes, k_params)

    observation = jax.random.normal(k_obs, (B,) + observation_shape,
                                    dtype=jnp.float32)
    prev_action = None   # unused by the module's forward (matches rlpyt)
    prev_reward = None   # unused by the module's forward (matches rlpyt)

    v = model(observation, prev_action, prev_reward)
    v = jax.block_until_ready(v)

    v_ref = _reference_forward(model, observation)
    assert v.shape == (B,), v.shape
    assert jnp.allclose(v, v_ref, atol=1e-2, rtol=1e-2), (v, v_ref)

    print("KERNEL_OK")
</pallas_src>

<mosaic_0001>
module attributes {stable_mosaic.version = 11 : i64} {
  func.func @kernel(%arg0: i32, %arg1: memref<8x128xf32, #tpu.memory_space<vmem>>, %arg2: memref<128x256xbf16, #tpu.memory_space<vmem>>, %arg3: memref<1x256xf32, #tpu.memory_space<vmem>>, %arg4: memref<256x256xbf16, #tpu.memory_space<vmem>>, %arg5: memref<1x256xf32, #tpu.memory_space<vmem>>, %arg6: memref<256x8xf32, #tpu.memory_space<vmem>>, %arg7: memref<1x1xf32, #tpu.memory_space<vmem>>, %arg8: memref<8x8xf32, #tpu.memory_space<vmem>>) attributes {dimension_semantics = [#tpu.dimension_semantics<parallel>], iteration_bounds = array<i64: 1>, scalar_prefetch = 0 : i64, scratch_operands = 0 : i64, tpu.core_type = #tpu.core_type<tc>, window_params = [{transform_indices = @transform_0, window_bounds = array<i64: 8, 128>}, {pipeline_mode = #tpu.pipeline_mode<synchronous>, transform_indices = @transform_1, window_bounds = array<i64: 128, 256>}, {pipeline_mode = #tpu.pipeline_mode<synchronous>, transform_indices = @transform_2, window_bounds = array<i64: 1, 256>}, {pipeline_mode = #tpu.pipeline_mode<synchronous>, transform_indices = @transform_3, window_bounds = array<i64: 256, 256>}, {pipeline_mode = #tpu.pipeline_mode<synchronous>, transform_indices = @transform_4, window_bounds = array<i64: 1, 256>}, {pipeline_mode = #tpu.pipeline_mode<synchronous>, transform_indices = @transform_5, window_bounds = array<i64: 256, 8>}, {pipeline_mode = #tpu.pipeline_mode<synchronous>, transform_indices = @transform_6, window_bounds = array<i64: 1, 1>}, {transform_indices = @transform_7, window_bounds = array<i64: 8, 8>}]} {
    %c0 = arith.constant 0 : index
    %c0_0 = arith.constant 0 : index
    %0 = vector.load %arg1[%c0, %c0_0] : memref<8x128xf32, #tpu.memory_space<vmem>>, vector<8x128xf32>
    %c0_1 = arith.constant 0 : index
    %c0_2 = arith.constant 0 : index
    %1 = vector.load %arg2[%c0_1, %c0_2] : memref<128x256xbf16, #tpu.memory_space<vmem>>, vector<128x256xbf16>
    %c0_3 = arith.constant 0 : index
    %c0_4 = arith.constant 0 : index
    %2 = vector.load %arg3[%c0_3, %c0_4] : memref<1x256xf32, #tpu.memory_space<vmem>>, vector<1x256xf32>
    %3 = arith.truncf %0 : vector<8x128xf32> to vector<8x128xbf16>
    %cst = arith.constant dense<0.000000e+00> : vector<8x256xf32>
    %4 = tpu.matmul %3, %1, %cst {dimension_numbers = #tpu.dot_dimension_numbers<[1], [0], [0], [1], [0, 0, 1, 1], [], []>} : vector<8x128xbf16>, vector<128x256xbf16>, vector<8x256xf32> -> vector<8x256xf32>
    %5 = vector.broadcast %2 : vector<1x256xf32> to vector<8x256xf32>
    %6 = arith.addf %4, %5 : vector<8x256xf32>
    %cst_5 = arith.constant 0.000000e+00 : f32
    %7 = vector.broadcast %cst_5 : f32 to vector<8x256xf32>
    %8 = arith.maximumf %6, %7 : vector<8x256xf32>
    %c0_6 = arith.constant 0 : index
    %c0_7 = arith.constant 0 : index
    %9 = vector.load %arg4[%c0_6, %c0_7] : memref<256x256xbf16, #tpu.memory_space<vmem>>, vector<256x256xbf16>
    %c0_8 = arith.constant 0 : index
    %c0_9 = arith.constant 0 : index
    %10 = vector.load %arg5[%c0_8, %c0_9] : memref<1x256xf32, #tpu.memory_space<vmem>>, vector<1x256xf32>
    %11 = arith.truncf %8 : vector<8x256xf32> to vector<8x256xbf16>
    %cst_10 = arith.constant dense<0.000000e+00> : vector<8x256xf32>
    %12 = tpu.matmul %11, %9, %cst_10 {dimension_numbers = #tpu.dot_dimension_numbers<[1], [0], [0], [1], [0, 0, 1, 1], [], []>} : vector<8x256xbf16>, vector<256x256xbf16>, vector<8x256xf32> -> vector<8x256xf32>
    %13 = vector.broadcast %10 : vector<1x256xf32> to vector<8x256xf32>
    %14 = arith.addf %12, %13 : vector<8x256xf32>
    %cst_11 = arith.constant 0.000000e+00 : f32
    %15 = vector.broadcast %cst_11 : f32 to vector<8x256xf32>
    %16 = arith.maximumf %14, %15 : vector<8x256xf32>
    %c0_12 = arith.constant 0 : index
    %c0_13 = arith.constant 0 : index
    %17 = vector.load %arg6[%c0_12, %c0_13] : memref<256x8xf32, #tpu.memory_space<vmem>>, vector<256x8xf32>
    %cst_14 = arith.constant dense<0.000000e+00> : vector<8x8xf32>
    %18 = tpu.matmul %16, %17, %cst_14 {dimension_numbers = #tpu.dot_dimension_numbers<[1], [0], [0], [1], [0, 0, 1, 1], [], []>} : vector<8x256xf32>, vector<256x8xf32>, vector<8x8xf32> -> vector<8x8xf32>
    %c0_15 = arith.constant 0 : index
    %c0_16 = arith.constant 0 : index
    %19 = vector.load %arg7[%c0_15, %c0_16] : memref<1x1xf32, #tpu.memory_space<vmem>>, vector<1x1xf32>
    %20 = vector.extract %19[0, 0] : f32 from vector<1x1xf32>
    %21 = vector.broadcast %20 : f32 to vector<8x8xf32>
    %22 = arith.addf %18, %21 : vector<8x8xf32>
    %c0_17 = arith.constant 0 : index
    %c0_18 = arith.constant 0 : index
    %23 = vector.load %arg8[%c0_17, %c0_18] : memref<8x8xf32, #tpu.memory_space<vmem>>, vector<8x8xf32>
    tpu.vector_store %arg8[%c0_17, %c0_18], %22 {strides = array<i32>} : memref<8x8xf32, #tpu.memory_space<vmem>>, vector<8x8xf32>,
    return
  }
  func.func @transform_0(%arg0: i32) -> (i32, i32) {
    %c0_i32 = arith.constant 0 : i32
    %c0_i32_0 = arith.constant 0 : i32
    return %arg0, %c0_i32 : i32, i32
  }
  func.func @transform_1(%arg0: i32) -> (i32, i32) {
    %c0_i32 = arith.constant 0 : i32
    %c0_i32_0 = arith.constant 0 : i32
    %c0_i32_1 = arith.constant 0 : i32
    return %c0_i32, %c0_i32_0 : i32, i32
  }
  func.func @transform_2(%arg0: i32) -> (i32, i32) {
    %c0_i32 = arith.constant 0 : i32
    %c0_i32_0 = arith.constant 0 : i32
    %c0_i32_1 = arith.constant 0 : i32
    return %c0_i32, %c0_i32_0 : i32, i32
  }
  func.func @transform_3(%arg0: i32) -> (i32, i32) {
    %c0_i32 = arith.constant 0 : i32
    %c0_i32_0 = arith.constant 0 : i32
    %c0_i32_1 = arith.constant 0 : i32
    return %c0_i32, %c0_i32_0 : i32, i32
  }
  func.func @transform_4(%arg0: i32) -> (i32, i32) {
    %c0_i32 = arith.constant 0 : i32
    %c0_i32_0 = arith.constant 0 : i32
    %c0_i32_1 = arith.constant 0 : i32
    return %c0_i32, %c0_i32_0 : i32, i32
  }
  func.func @transform_5(%arg0: i32) -> (i32, i32) {
    %c0_i32 = arith.constant 0 : i32
    %c0_i32_0 = arith.constant 0 : i32
    %c0_i32_1 = arith.constant 0 : i32
    return %c0_i32, %c0_i32_0 : i32, i32
  }
  func.func @transform_6(%arg0: i32) -> (i32, i32) {
    %c0_i32 = arith.constant 0 : i32
    %c0_i32_0 = arith.constant 0 : i32
    %c0_i32_1 = arith.constant 0 : i32
    return %c0_i32, %c0_i32_0 : i32, i32
  }
  func.func @transform_7(%arg0: i32) -> (i32, i32) {
    %c0_i32 = arith.constant 0 : i32
    %c0_i32_0 = arith.constant 0 : i32
    return %arg0, %c0_i32 : i32, i32
  }
}

</mosaic_0001>

<bundles_post_ra>
// kernel: tpu_custom_call.1
= control target key start
LH: loop header
LB: loop body
LE: loop exit
PB: predicated region body
PF: predicated region fallthrough
CT: control target
= control target key end

     0   :  { %s1083_s0 = inlined_call_operand.vmem [shape: f32[8,128], index: 0, kind: input, shape index: {}]   ;;  %s1084_s1 = inlined_call_operand.hbm [shape: bf16[128,256], index: 1, kind: input, shape index: {}]   ;;  %s1085_s2 = inlined_call_operand.vmem [shape: f32[1,256], index: 2, kind: input, shape index: {}]   ;;  %s1086_s3 = inlined_call_operand.vmem [shape: bf16[256,256], index: 3, kind: input, shape index: {}]   ;;  %s1087_s4 = inlined_call_operand.vmem [shape: f32[1,256], index: 4, kind: input, shape index: {}]   ;;  %s1088_s5 = inlined_call_operand.vmem [shape: f32[256,8], index: 5, kind: input, shape index: {}]   ;;  %s1089_s6 = inlined_call_operand.<no memory space> [shape: f32[1,1], index: 6, kind: input, shape index: {}]   ;;  %s1090_s7 = inlined_call_operand.hbm [shape: f32[8,8], index: 7, kind: output, shape index: {}]  }
   0x1   :  { %v12_v0 = vstv %s1089_s6 }
   0x2   :  { %13 = vst [vmem:[#allocation2] sm:$0x1] %v12_v0 }
   0x3   :  { %14 = vsyncpa [#allocation4], 0 }
   0x4   :  { %15 = vsyncpa [#allocation5], 0  ;;  %s810_s26 = smov [#allocation3]   ;;  %s762_s30 = scalar_lea.hbm %s1084_s1, 2048 }
   0x5   :  { %s23_s27 = sshll.u32 %s810_s26, 4  ;;  %p763_p0 = scmp.ne.s32.totalorder %s1084_s1, %s762_s30  ;;  %s24_s27 = int_to_ptr.vmem [resolvable:$true] %s23_s27 }
   0x6   :  { %p766_p1 = scmp.lt.u32.totalorder %s762_s30, %s1084_s1 }
   0x8   :  { %p768_p2 = pnand %p766_p1, %p763_p0 }
   0xa   :  { %771 = shalt.err (!%p768_p2)
}
   0xb   :  { %s772_s6 = scalar_lea.vmem %s24_s27, 2048  ;;  %p777_p4 = scmp.lt.s32.totalorder %s24_s27, %s24_s27 }
   0xc   :  { %p773_p3 = scmp.ne.s32.totalorder %s24_s27, %s772_s6  ;;  %p778_p5 = scmp.lt.s32.totalorder %s772_s6, %s772_s6 }
   0xe   :  { %p779_p6 = por %p778_p5, %p777_p4 }
  0x10   :  { %p780_p7 = pnand %p779_p6, %p773_p3 }
  0x12   :  { %783 = shalt.err (!%p780_p7)
}
  0x13   :  { %s811_s12 = smov 128   ;;  %s812_s13 = smov 8  }
  0x14   :  { %29 = dma.hbm_to_vmem [thread:$0]  %s1084_s1, 2048, %s24_s27, [#allocation4], %s811_s12, %s811_s12, %s812_s13  }
  0x15   :  { %806 = dma.done.wait [#allocation4], 2048  }
  0x16   :  { %807 = vsyncadd [#allocation4], 4294965248  ;;  %v813_v1 = vmov 0   ;;  %v690_v2 = vld [vmem:[#allocation3 + $0x4] ss:$8 sps:$4 sm:$0xff]   ;;  %v465_v58 = vld [vmem:[%s1088_s5 + $0x98] sm:$0xff] }
  0x17   :  { %186 = vmatprep.mubr.bf16.mxu0 %v813_v1  ;;  %v692_v3 = vld [vmem:[#allocation3] ss:$8 sps:$4 sm:$0xff]   ;;  %154 = vmatprep.subr.bf16.mxu0 %v690_v2  ;;  %v693_v4 = vld [vmem:[#allocation3 + $0x14] ss:$8 sps:$4 sm:$0xff]   ;;  %v695_v5 = vld [vmem:[#allocation3 + $0x10] ss:$8 sps:$4 sm:$0xff]  }
  0x18   :  { %155 = vmatpush1.bf16.msra.mxu0 %v692_v3  ;;  %v696_v6 = vld [vmem:[#allocation3 + $0x24] ss:$8 sps:$4 sm:$0xff]   ;;  %v698_v7 = vld [vmem:[#allocation3 + $0x20] ss:$8 sps:$4 sm:$0xff]   ;;  %v699_v8 = vld [vmem:[#allocation3 + $0x34] ss:$8 sps:$4 sm:$0xff]  }
  0x19   :  { %156 = vmatprep.subr.bf16.mxu0 %v693_v4  ;;  %v701_v9 = vld [vmem:[#allocation3 + $0x30] ss:$8 sps:$4 sm:$0xff]   ;;  %v702_v10 = vld [vmem:[#allocation3 + $0x44] ss:$8 sps:$4 sm:$0xff]   ;;  %v704_v14 = vld [vmem:[#allocation3 + $0x40] ss:$8 sps:$4 sm:$0xff]  }
  0x1a   :  { %v714_v11 = vld [vmem:[%s1086_s3 + $0x4] ss:$8 sps:$4 sm:$0xff]   ;;  %v716_v12 = vld [vmem:[%s1086_s3] ss:$8 sps:$4 sm:$0xff]   ;;  %v717_v13 = vld [vmem:[%s1086_s3 + $0x14] ss:$8 sps:$4 sm:$0xff]  }
  0x1b   :  { %403 = vmatprep.subr.bf16.mxu1 %v714_v11  ;;  %v719_v15 = vld [vmem:[%s1086_s3 + $0x10] ss:$8 sps:$4 sm:$0xff]   ;;  %v720_v16 = vld [vmem:[%s1086_s3 + $0x24] ss:$8 sps:$4 sm:$0xff]   ;;  %v722_v19 = vld [vmem:[%s1086_s3 + $0x20] ss:$8 sps:$4 sm:$0xff]  }
  0x1c   :  { %157 = vmatpush1.bf16.msra.mxu0 %v695_v5  ;;  %404 = vmatpush1.bf16.msra.mxu1 %v716_v12  ;;  %v705_v17 = vld [vmem:[#allocation3 + $0x54] ss:$8 sps:$4 sm:$0xff]   ;;  %v707_v18 = vld [vmem:[#allocation3 + $0x50] ss:$8 sps:$4 sm:$0xff]   ;;  %v708_v21 = vld [vmem:[#allocation3 + $0x64] ss:$8 sps:$4 sm:$0xff]  }
  0x1d   :  { %158 = vmatprep.subr.bf16.mxu0 %v696_v6  ;;  %405 = vmatprep.subr.bf16.mxu1 %v717_v13  ;;  %v723_v20 = vld [vmem:[%s1086_s3 + $0x34] ss:$8 sps:$4 sm:$0xff]   ;;  %v710_v22 = vld [vmem:[#allocation3 + $0x60] ss:$8 sps:$4 sm:$0xff]   ;;  %v725_v23 = vld [vmem:[%s1086_s3 + $0x30] ss:$8 sps:$4 sm:$0xff]  }
  0x1e   :  { %v726_v24 = vld [vmem:[%s1086_s3 + $0x44] ss:$8 sps:$4 sm:$0xff]   ;;  %v711_v25 = vld [vmem:[#allocation3 + $0x74] ss:$8 sps:$4 sm:$0xff]   ;;  %v713_v26 = vld [vmem:[#allocation3 + $0x70] ss:$8 sps:$4 sm:$0xff]  }
  0x1f   :  { %v44_v27 = vld [vmem:[%s1083_s0] sm:$0xff]  ;;  %v729_v29 = vld [vmem:[%s1086_s3 + $0x54] ss:$8 sps:$4 sm:$0xff]   ;;  %v731_v30 = vld [vmem:[%s1086_s3 + $0x50] ss:$8 sps:$4 sm:$0xff]   ;;  %s814_s0 = smov [#allocation6]  }
  0x20   :  { %159 = vmatpush1.bf16.msra.mxu0 %v698_v7  ;;  %406 = vmatpush1.bf16.msra.mxu1 %v719_v15  ;;  %v728_v28 = vld [vmem:[%s1086_s3 + $0x40] ss:$8 sps:$4 sm:$0xff]   ;;  %v62_v31 = vpack.c.bf16 %v44_v27, %v44_v27  ;;  %v732_v32 = vld [vmem:[%s1086_s3 + $0x64] ss:$8 sps:$4 sm:$0xff]   ;;  %v735_v34 = vld [vmem:[%s1086_s3 + $0x74] ss:$8 sps:$4 sm:$0xff]   ;;  %v64_v27 = vlaneseq }
  0x21   :  { %160 = vmatprep.subr.bf16.mxu0 %v699_v8  ;;  %407 = vmatprep.subr.bf16.mxu1 %v720_v16  ;;  %v734_v33 = vld [vmem:[%s1086_s3 + $0x60] ss:$8 sps:$4 sm:$0xff]   ;;  %v737_v35 = vld [vmem:[%s1086_s3 + $0x70] ss:$8 sps:$4 sm:$0xff]   ;;  %v738_v36 = vld [vmem:[%s1086_s3 + $0x84] ss:$8 sps:$4 sm:$0xff]  }
  0x22   :  { %v740_v37 = vld [vmem:[%s1086_s3 + $0x80] ss:$8 sps:$4 sm:$0xff]   ;;  %v741_v38 = vld [vmem:[%s1086_s3 + $0x94] ss:$8 sps:$4 sm:$0xff]   ;;  %v743_v39 = vld [vmem:[%s1086_s3 + $0x90] ss:$8 sps:$4 sm:$0xff]  }
  0x23   :  { %v744_v40 = vld [vmem:[%s1086_s3 + $0xa4] ss:$8 sps:$4 sm:$0xff]   ;;  %v746_v41 = vld [vmem:[%s1086_s3 + $0xa0] ss:$8 sps:$4 sm:$0xff]   ;;  %v747_v42 = vld [vmem:[%s1086_s3 + $0xb4] ss:$8 sps:$4 sm:$0xff]  }
  0x24   :  { %161 = vmatpush1.bf16.msra.mxu0 %v701_v9  ;;  %408 = vmatpush1.bf16.msra.mxu1 %v722_v19  ;;  %v749_v43 = vld [vmem:[%s1086_s3 + $0xb0] ss:$8 sps:$4 sm:$0xff]   ;;  %v750_v44 = vld [vmem:[%s1086_s3 + $0xc4] ss:$8 sps:$4 sm:$0xff]   ;;  %v752_v45 = vld [vmem:[%s1086_s3 + $0xc0] ss:$8 sps:$4 sm:$0xff]  }
  0x25   :  { %162 = vmatprep.subr.bf16.mxu0 %v702_v10  ;;  %409 = vmatprep.subr.bf16.mxu1 %v723_v20  ;;  %v753_v46 = vld [vmem:[%s1086_s3 + $0xd4] ss:$8 sps:$4 sm:$0xff]   ;;  %v755_v47 = vld [vmem:[%s1086_s3 + $0xd0] ss:$8 sps:$4 sm:$0xff]   ;;  %v756_v48 = vld [vmem:[%s1086_s3 + $0xe4] ss:$8 sps:$4 sm:$0xff]  }
  0x26   :  { %v758_v49 = vld [vmem:[%s1086_s3 + $0xe0] ss:$8 sps:$4 sm:$0xff]   ;;  %v759_v50 = vld [vmem:[%s1086_s3 + $0xf4] ss:$8 sps:$4 sm:$0xff]   ;;  %v761_v51 = vld [vmem:[%s1086_s3 + $0xf0] ss:$8 sps:$4 sm:$0xff]  }
  0x27   :  { %v462_v52 = vld [vmem:[%s1088_s5 + $0x80] sm:$0xff]  ;;  %v463_v53 = vld [vmem:[%s1088_s5 + $0x88] sm:$0xff]  ;;  %v464_v57 = vld [vmem:[%s1088_s5 + $0x90] sm:$0xff]  ;;  %s559_s16 = sshll.u32 %s814_s0, 4  ;;  %vm551_vm0 = vcmask 64512   ;;  %s560_s16 = int_to_ptr.vmem [resolvable:$true] %s559_s16 }
  0x28   :  { %163 = vmatpush1.bf16.msra.mxu0 %v704_v14  ;;  %410 = vmatpush1.bf16.msra.mxu1 %v725_v23  ;;  %v446_v54 = vld [vmem:[%s1088_s5] sm:$0xff]  ;;  %v651_v55 = vpack.c.bf16 %v463_v53, %v462_v52  ;;  %v447_v56 = vld [vmem:[%s1088_s5 + $0x8] sm:$0xff]  ;;  %v655_v60 = vpack.c.bf16 %v465_v58, %v464_v57  ;;  %v448_v61 = vld [vmem:[%s1088_s5 + $0x10] sm:$0xff]  ;;  %p789_p9 = scmp.lt.s32.totalorder %s560_s16, %s560_s16 }
  0x29   :  { %164 = vmatprep.subr.bf16.mxu0 %v705_v17  ;;  %411 = vmatprep.subr.bf16.mxu1 %v726_v24  ;;  %v653_v59 = vpack.c.bf16 %v447_v56, %v446_v54  ;;  %v449_v62 = vld [vmem:[%s1088_s5 + $0x18] sm:$0xff]  ;;  %v466_v63 = vld [vmem:[%s1088_s5 + $0xa0] sm:$0xff]  ;;  %v467_v0 = vld [vmem:[%s1088_s5 + $0xa8] sm:$0xff] }
  0x2a   :  { %v657_v1 = vpack.c.bf16 %v449_v62, %v448_v61  ;;  %v659_v2 = vpack.c.bf16 %v467_v0, %v466_v63  ;;  %v450_v3 = vld [vmem:[%s1088_s5 + $0x20] sm:$0xff]  ;;  %v451_v4 = vld [vmem:[%s1088_s5 + $0x28] sm:$0xff]  ;;  %v468_v5 = vld [vmem:[%s1088_s5 + $0xb0] sm:$0xff] }
  0x2b   :  { %v469_v6 = vld [vmem:[%s1088_s5 + $0xb8] sm:$0xff]  ;;  %v661_v7 = vpack.c.bf16 %v451_v4, %v450_v3  ;;  %v452_v9 = vld [vmem:[%s1088_s5 + $0x30] sm:$0xff]  ;;  %v470_v11 = vld [vmem:[%s1088_s5 + $0xc0] sm:$0xff] }
  0x2c   :  { %165 = vmatpush1.bf16.msra.mxu0 %v707_v18  ;;  %412 = vmatpush1.bf16.msra.mxu1 %v728_v28  ;;  %v663_v8 = vpack.c.bf16 %v469_v6, %v468_v5  ;;  %v453_v10 = vld [vmem:[%s1088_s5 + $0x38] sm:$0xff]  ;;  %v471_v12 = vld [vmem:[%s1088_s5 + $0xc8] sm:$0xff]  ;;  %v454_v15 = vld [vmem:[%s1088_s5 + $0x40] sm:$0xff]  ;;  %v65_v28 = vshrl.u32 %v64_v27, 7 }
  0x2d   :  { %166 = vmatprep.subr.bf16.mxu0 %v708_v21  ;;  %413 = vmatprep.subr.bf16.mxu1 %v729_v29  ;;  %v665_v13 = vpack.c.bf16 %v453_v10, %v452_v9  ;;  %v667_v14 = vpack.c.bf16 %v471_v12, %v470_v11  ;;  %v455_v16 = vld [vmem:[%s1088_s5 + $0x48] sm:$0xff]  ;;  %v472_v17 = vld [vmem:[%s1088_s5 + $0xd0] sm:$0xff]  ;;  %v473_v18 = vld [vmem:[%s1088_s5 + $0xd8] sm:$0xff] }
  0x2e   :  { %v669_v19 = vpack.c.bf16 %v455_v16, %v454_v15  ;;  %v671_v20 = vpack.c.bf16 %v473_v18, %v472_v17  ;;  %v456_v21 = vld [vmem:[%s1088_s5 + $0x50] sm:$0xff]  ;;  %v474_v23 = vld [vmem:[%s1088_s5 + $0xe0] sm:$0xff]  ;;  %v475_v24 = vld [vmem:[%s1088_s5 + $0xe8] sm:$0xff]  ;;  %v66_v29 = vsub.s32 0, %v65_v28 }
  0x2f   :  { %v478_v53 = vld [vmem:[#allocation2] sm:$0x1] }
  0x30   :  { %167 = vmatpush1.bf16.msra.mxu0 %v710_v22  ;;  %414 = vmatpush1.bf16.msra.mxu1 %v731_v30  ;;  %v457_v22 = vld [vmem:[%s1088_s5 + $0x58] sm:$0xff]  ;;  %v61_v30 = vld [vmem:[%s1085_s2] sm:$0x3]  ;;  %683 = vpush %v478_v53 }
  0x31   :  { %168 = vmatprep.subr.bf16.mxu0 %v711_v25  ;;  %415 = vmatprep.subr.bf16.mxu1 %v732_v32  ;;  %v673_v25 = vpack.c.bf16 %v457_v22, %v456_v21  ;;  %v67_v32 = vrot.slane %v61_v30, %v66_v29  ;;  %v229_v54 = vld [vmem:[%s1087_s4] sm:$0x3]  ;;  %s784_s4 = scalar_lea.vmem %s560_s16, 128 }
  0x32   :  { %p785_p8 = scmp.ne.s32.totalorder %s560_s16, %s784_s4  ;;  %p790_p10 = scmp.lt.s32.totalorder %s784_s4, %s784_s4 }
  0x34   :  { %169 = vmatpush1.bf16.msra.mxu0 %v713_v26  ;;  %416 = vmatpush1.bf16.msra.mxu1 %v734_v33  ;;  %v675_v26 = vpack.c.bf16 %v475_v24, %v474_v23  ;;  %p791_p11 = por %p790_p10, %p789_p9 }
  0x35   :  { %417 = vmatprep.subr.bf16.mxu1 %v735_v34  ;;  %652 = vmatprep.subr.bf16.mxu0 %v651_v55  ;;  %v236_v55 = vrot.slane %v229_v54, %v66_v29 }
  0x36   :  { %p792_p12 = pnand %p791_p11, %p785_p8 }
  0x37   :  { %187 = vmatmul.mubr.bf16.vlgmr.msra.gmra.mrb[0].mxu0 %v62_v31  ;;  %v70_v31 = vsub.s32 1, %v65_v28 }
  0x38   :  { %418 = vmatpush1.bf16.msra.mxu1 %v737_v35  ;;  %654 = vmatpush3.bf16.msra.mxu0 %v653_v59 }
  0x39   :  { %419 = vmatprep.subr.bf16.mxu1 %v738_v36  ;;  %656 = vmatprep.subr.bf16.mxu0 %v655_v60  ;;  %v71_v33 = vrot.slane %v61_v30, %v70_v31  ;;  %v240_v56 = vrot.slane %v229_v54, %v70_v31 }
  0x3c   :  { %420 = vmatpush1.bf16.msra.mxu1 %v740_v37  ;;  %658 = vmatpush3.bf16.msra.mxu0 %v657_v1 }
  0x3d   :  { %421 = vmatprep.subr.bf16.mxu1 %v741_v38  ;;  %660 = vmatprep.subr.bf16.mxu0 %v659_v2 }
  0x40   :  { %422 = vmatpush1.bf16.msra.mxu1 %v743_v39  ;;  %662 = vmatpush3.bf16.msra.mxu0 %v661_v7 }
  0x41   :  { %423 = vmatprep.subr.bf16.mxu1 %v744_v40  ;;  %664 = vmatprep.subr.bf16.mxu0 %v663_v8 }
  0x44   :  { %424 = vmatpush1.bf16.msra.mxu1 %v746_v41  ;;  %666 = vmatpush3.bf16.msra.mxu0 %v665_v13 }
  0x45   :  { %425 = vmatprep.subr.bf16.mxu1 %v747_v42  ;;  %668 = vmatprep.subr.bf16.mxu0 %v667_v14 }
  0x48   :  { %426 = vmatpush1.bf16.msra.mxu1 %v749_v43  ;;  %670 = vmatpush3.bf16.msra.mxu0 %v669_v19 }
  0x49   :  { %427 = vmatprep.subr.bf16.mxu1 %v750_v44  ;;  %672 = vmatprep.subr.bf16.mxu0 %v671_v20  ;;  %v458_v44 = vld [vmem:[%s1088_s5 + $0x60] sm:$0xff] }
  0x4c   :  { %428 = vmatpush1.bf16.msra.mxu1 %v752_v45  ;;  %674 = vmatpush3.bf16.msra.mxu0 %v673_v25  ;;  %v459_v45 = vld [vmem:[%s1088_s5 + $0x68] sm:$0xff] }
  0x4d   :  { %429 = vmatprep.subr.bf16.mxu1 %v753_v46  ;;  %676 = vmatprep.subr.bf16.mxu0 %v675_v26  ;;  %v677_v46 = vpack.c.bf16 %v459_v45, %v458_v44 }
  0x50   :  { %430 = vmatpush1.bf16.msra.mxu1 %v755_v47  ;;  %678 = vmatpush3.bf16.msra.mxu0 %v677_v46  ;;  %v476_v47 = vld [vmem:[%s1088_s5 + $0xf0] sm:$0xff] }
  0x51   :  { %431 = vmatprep.subr.bf16.mxu1 %v756_v48  ;;  %v477_v48 = vld [vmem:[%s1088_s5 + $0xf8] sm:$0xff] }
  0x54   :  { %432 = vmatpush1.bf16.msra.mxu1 %v758_v49  ;;  %v679_v49 = vpack.c.bf16 %v477_v48, %v476_v47 }
  0x55   :  { %433 = vmatprep.subr.bf16.mxu1 %v759_v50  ;;  %v460_v50 = vld [vmem:[%s1088_s5 + $0x70] sm:$0xff] }
  0x56   :  { %680 = vmatprep.subr.bf16.mxu0 %v679_v49 }
  0x58   :  { %434 = vmatpush1.bf16.msra.mxu1 %v761_v51  ;;  %v461_v51 = vld [vmem:[%s1088_s5 + $0x78] sm:$0xff] }
  0x59   :  { %v681_v52 = vpack.c.bf16 %v461_v51, %v460_v50 }
  0x5b   :  { %682 = vmatpush3.bf16.msra.mxu0 %v681_v52 }
  0x61   :  { %s684_s5 = spop %683 }
  0x62   :  { %v480_v3 = vstv %s684_s5 }
 0x10a   :  { %v188_v34 = vpop.f32.mrb[0].mxu0 }
 0x10b   :  { %v189_v35 = vadd.f32 %v188_v34, %v67_v32  ;;  %v190_v36 = vpop.f32.mrb[1].mxu0 }
 0x10c   :  { %v191_v37 = vadd.f32 %v190_v36, %v71_v33  ;;  %v192_v38 = vpop.f32.mrb[2].mxu0 }
 0x10d   :  { %v195_v39 = vmax.f32 %v189_v35, 0.0  ;;  %v193_v40 = vpop.f32.mrb[3].mxu0 }
 0x10e   :  { %v196_v41 = vmax.f32 %v191_v37, 0.0 }
 0x10f   :  { %v230_v43 = vpack.c.bf16 %v195_v39, %v195_v39 }
 0x110   :  { %v231_v42 = vpack.c.bf16 %v196_v41, %v196_v41 }
 0x112   :  { %435 = vmatprep.mubr.bf16.mxu1 %v231_v42 }
 0x113   :  { %436 = vmatmul.mubr.bf16.vlgmr.msra.gmra.mrb[0].mxu1 %v230_v43 }
 0x1e6   :  { %v437_v57 = vpop.f32.mrb[0].mxu1 }
 0x1e7   :  { %v438_v58 = vadd.f32 %v437_v57, %v236_v55  ;;  %v439_v59 = vpop.f32.mrb[1].mxu1 }
 0x1e8   :  { %v440_v60 = vadd.f32 %v439_v59, %v240_v56  ;;  %v441_v61 = vpop.f32.mrb[2].mxu1 }
 0x1e9   :  { %v442_v62 = vpop.f32.mrb[3].mxu1  ;;  %v444_v0 = vmax.f32 %v438_v58, 0.0 }
 0x1ea   :  { %v445_v63 = vmax.f32 %v440_v60, 0.0 }
 0x1ec   :  { %545 = vmatprep.mubr.f32.mxu0 %v445_v63 }
 0x1ed   :  { %546 = vmatmul.mubr.f32.vlgmr.msra.gmra.mrb[4].mxu0 %v444_v0 }
 0x2c0   :  { %v648_v1 = vpop.f32.mrb[4].mxu0 }
 0x2c1   :  { %v649_v2 = vpop.f32.mrb[5].mxu0 }
 0x2c2   :  { %v650_v4 = vadd.f32 %v649_v2, %v648_v1 }
 0x2c4   :  { %v548_v5 = vadd.f32 %v650_v4, %v480_v3 }
 0x2c6   :  { %552 = vst.msk [vmem:[#allocation6] sm:$0xff] %vm551_vm0, %v548_v5 }
 0x2c7   :  { %795 = shalt.err (!%p792_p12)
}
 0x2c8   :  { %s796_s19 = scalar_lea.hbm %s1090_s7, 128 }
 0x2c9   :  { %p797_p13 = scmp.ne.s32.totalorder %s1090_s7, %s796_s19  ;;  %p800_p0 = scmp.lt.u32.totalorder %s796_s19, %s1090_s7 }
 0x2cb   :  { %p802_p1 = pnand %p800_p0, %p797_p13 }
 0x2cd   :  { %805 = shalt.err (!%p802_p1)
}
 0x2ce   :  { %562 = dma.vmem_to_hbm [thread:$0]  %s560_s16, 128, %s1090_s7, [#allocation5]  }
 0x2cf   :  { %808 = dma.done.wait [#allocation5], 128  }
 0x2d0   :  { %809 = vsyncadd [#allocation5], 4294967168 }
 0x2d1   :  { %566 = vsyncpa [#allocation4], 1 }
 0x2d2   :  { %567 = vsyncpa [#allocation5], 1 }

</bundles_post_ra>
